<compile_context>
chip_gen: v7x
topology: tpu7x:2x2x1
jax: 0.10.0
libtpu: 0.0.40
codegen_flags: <defaults>
</compile_context>

<pallas_src>
import jax
import jax.numpy as jnp
from jax.experimental import pallas as pl
from jax.experimental.pallas import tpu as pltpu

N = 128        # number of non-periodic sampler points
D_IN = 2       # (periodic coordinate, non-periodic coordinate t)
HIDDEN = 32    # MLP hidden width
D_OUT = 4      # network output dimension ("space" dim reduced by SquaredError)


def _periodic_sq_error_kernel(t_ref, params_ref, w2t_ref, loss_ref):
    # t_ref:      (1, N)        points on the lane axis
    # params_ref: (HIDDEN, 3)   columns = [w1_t, b1_left, b1_right]
    # w2t_ref:    (D_OUT, HIDDEN)
    n = t_ref.shape[1]

    t_row = t_ref[...]                       # (1, N)
    w1t = params_ref[:, 0:1]                 # (H, 1) static lane slice
    b1l = params_ref[:, 1:2]                 # (H, 1)
    b1r = params_ref[:, 2:3]                 # (H, 1)

    # First layer as a VPU broadcast outer product (no K=2 MXU pass):
    # z[h, n] = w1_t[h] * t[n]  ->  (H, N), fully lane-packed.
    z = w1t * t_row                          # (H, N)

    # Boundary column already folded into the two biases; b2 cancels exactly.
    h_diff = jnp.tanh(z + b1l) - jnp.tanh(z + b1r)      # (H, N)

    # Second layer: one MXU matmul, lane-dense (D_OUT, N) result.
    r = jnp.dot(w2t_ref[...], h_diff,
                preferred_element_type=jnp.float32)     # (D_OUT, N)

    # SquaredError (sum over space dim) + mean over points in one reduce.
    loss_ref[...] = (jnp.sum(r * r) * (1.0 / n)).reshape(1, 1)


def periodic_condition_loss(t, interval_left, interval_right, w1, b1, w2, b2):
    """Scalar periodic-condition loss.  Plain-JAX glue only re-layouts the
    tiny parameter tensors (transpose + boundary-column fold) into one packed
    tile; b2 cancels exactly in the residual and never enters the kernel."""
    del b2
    n = t.shape[0]

    t_row = t.reshape(1, n)                                  # (1, N)
    w1t_col = w1[1:2, :].T                                   # (H, 1)
    b1l_col = (b1 + interval_left * w1[0:1, :]).T            # (H, 1)
    b1r_col = (b1 + interval_right * w1[0:1, :]).T           # (H, 1)
    params = jnp.concatenate([w1t_col, b1l_col, b1r_col], axis=1)  # (H, 3)
    w2t = w2.T                                               # (D_OUT, H)

    hidden = w1.shape[1]
    d_out = w2.shape[1]
    cost = pl.CostEstimate(
        flops=2 * d_out * hidden * n + 6 * hidden * n,
        transcendentals=2 * hidden * n,
        bytes_accessed=4 * (t_row.size + params.size + w2t.size + 1),
    )

    out = pl.pallas_call(
        _periodic_sq_error_kernel,
        out_shape=jax.ShapeDtypeStruct((1, 1), jnp.float32),
        in_specs=[pl.BlockSpec(memory_space=pltpu.MemorySpace.VMEM)] * 3,
        out_specs=pl.BlockSpec(memory_space=pltpu.MemorySpace.VMEM),
        cost_estimate=cost,
    )(t_row, params, w2t)
    return out[0, 0]


def _reference_loss(t, interval_left, interval_right, w1, b1, w2, b2):
    x_left = jnp.concatenate(
        [jnp.full_like(t, interval_left), t], axis=1)
    x_right = jnp.concatenate(
        [jnp.full_like(t, interval_right), t], axis=1)

    def mlp(x):
        return jnp.tanh(x @ w1 + b1) @ w2 + b2

    residual = mlp(x_left) - mlp(x_right)
    unreduced = jnp.sum(jnp.square(residual), axis=1)   # SquaredError.forward
    return jnp.mean(unreduced)                          # reduce_fn


if __name__ == "__main__":
    key = jax.random.PRNGKey(0)
    k_t, k_w1, k_b1, k_w2, k_b2 = jax.random.split(key, 5)

    # Non-periodic sampler points (e.g. time axis t), periodic interval [0, 1].
    t = jax.random.uniform(k_t, (N, 1), dtype=jnp.float32)
    interval_left, interval_right = 0.0, 1.0

    # Deterministic synthetic "module" (MLP) parameters.
    w1 = 0.5 * jax.random.normal(k_w1, (D_IN, HIDDEN), jnp.float32)
    b1 = 0.1 * jax.random.normal(k_b1, (1, HIDDEN), jnp.float32)
    w2 = 0.5 * jax.random.normal(k_w2, (HIDDEN, D_OUT), jnp.float32)
    b2 = 0.1 * jax.random.normal(k_b2, (1, D_OUT), jnp.float32)

    loss = periodic_condition_loss(
        t, interval_left, interval_right, w1, b1, w2, b2)
    loss = jax.block_until_ready(loss)

    ref = _reference_loss(t, interval_left, interval_right, w1, b1, w2, b2)
    assert jnp.allclose(loss, ref, rtol=1e-4, atol=1e-6), (loss, ref)

    print("KERNEL_OK")
</pallas_src>

<mosaic_0001>
module attributes {stable_mosaic.version = 11 : i64} {
  func.func @_periodic_sq_error_kernel(%arg0: memref<1x128xf32, #tpu.memory_space<vmem>>, %arg1: memref<32x3xf32, #tpu.memory_space<vmem>>, %arg2: memref<4x32xf32, #tpu.memory_space<vmem>>, %arg3: memref<1x1xf32, #tpu.memory_space<vmem>>) attributes {dimension_semantics = [], scalar_prefetch = 0 : i64, scratch_operands = 0 : i64, tpu.core_type = #tpu.core_type<tc>} {
    %c0 = arith.constant 0 : index
    %c0_0 = arith.constant 0 : index
    %0 = vector.load %arg0[%c0, %c0_0] : memref<1x128xf32, #tpu.memory_space<vmem>>, vector<1x128xf32>
    %c0_1 = arith.constant 0 : index
    %c0_2 = arith.constant 0 : index
    %1 = vector.load %arg1[%c0_1, %c0_2] : memref<32x3xf32, #tpu.memory_space<vmem>>, vector<32x1xf32>
    %c0_3 = arith.constant 0 : index
    %c1 = arith.constant 1 : index
    %2 = vector.load %arg1[%c0_3, %c1] : memref<32x3xf32, #tpu.memory_space<vmem>>, vector<32x1xf32>
    %c0_4 = arith.constant 0 : index
    %c2 = arith.constant 2 : index
    %3 = vector.load %arg1[%c0_4, %c2] : memref<32x3xf32, #tpu.memory_space<vmem>>, vector<32x1xf32>
    %4 = vector.broadcast %1 : vector<32x1xf32> to vector<32x128xf32>
    %5 = vector.broadcast %0 : vector<1x128xf32> to vector<32x128xf32>
    %6 = arith.mulf %4, %5 : vector<32x128xf32>
    %7 = vector.broadcast %2 : vector<32x1xf32> to vector<32x128xf32>
    %8 = arith.addf %6, %7 : vector<32x128xf32>
    %9 = math.tanh %8 : vector<32x128xf32>
    %10 = vector.broadcast %3 : vector<32x1xf32> to vector<32x128xf32>
    %11 = arith.addf %6, %10 : vector<32x128xf32>
    %12 = math.tanh %11 : vector<32x128xf32>
    %13 = arith.subf %9, %12 : vector<32x128xf32>
    %c0_5 = arith.constant 0 : index
    %c0_6 = arith.constant 0 : index
    %14 = vector.load %arg2[%c0_5, %c0_6] : memref<4x32xf32, #tpu.memory_space<vmem>>, vector<4x32xf32>
    %cst = arith.constant dense<0.000000e+00> : vector<4x128xf32>
    %15 = tpu.matmul %14, %13, %cst {dimension_numbers = #tpu.dot_dimension_numbers<[1], [0], [0], [1], [0, 0, 1, 1], [], []>} : vector<4x32xf32>, vector<32x128xf32>, vector<4x128xf32> -> vector<4x128xf32>
    %16 = arith.mulf %15, %15 : vector<4x128xf32>
    %17 = vector.shape_cast %16 : vector<4x128xf32> to vector<1x4x128xf32>
    %cst_7 = arith.constant dense<0.000000e+00> : vector<1xf32>
    %18 = vector.multi_reduction <add>, %17, %cst_7 [1, 2] : vector<1x4x128xf32> to vector<1xf32>
    %19 = vector.shape_cast %18 : vector<1xf32> to vector<1x1x1xf32>
    %20 = vector.extract %19[0, 0, 0] : f32 from vector<1x1x1xf32>
    %cst_8 = arith.constant 7.812500e-03 : f32
    %21 = arith.mulf %20, %cst_8 : f32
    %22 = vector.broadcast %21 : f32 to vector<1x1xf32>
    %c0_9 = arith.constant 0 : index
    %c0_10 = arith.constant 0 : index
    %23 = vector.load %arg3[%c0_9, %c0_10] : memref<1x1xf32, #tpu.memory_space<vmem>>, vector<1x1xf32>
    tpu.vector_store %arg3[%c0_9, %c0_10], %22 {strides = array<i32>} : memref<1x1xf32, #tpu.memory_space<vmem>>, vector<1x1xf32>,
    return
  }
}

</mosaic_0001>

<bundles_post_ra>
// kernel: tpu_custom_call.1
= control target key start
LH: loop header
LB: loop body
LE: loop exit
PB: predicated region body
PF: predicated region fallthrough
CT: control target
= control target key end

     0   :  { %v287_v1 = vmov 1   ;;  %v288_v2 = vmov 0   ;;  %s344_s0 = inlined_call_operand.vmem [shape: f32[1,128], index: 0, kind: input, shape index: {}]   ;;  %s345_s1 = inlined_call_operand.vmem [shape: f32[32,3], index: 1, kind: input, shape index: {}]   ;;  %s346_s2 = inlined_call_operand.vmem [shape: f32[4,32], index: 2, kind: input, shape index: {}]   ;;  %s347_s3 = inlined_call_operand.hbm [shape: f32[1,1], index: 3, kind: output, shape index: {}]  }
   0x1   :  { %v16_v0 = vld [vmem:[%s345_s1] sm:$0xff]  ;;  %241 = vset.pattern.permute.xlu1 %v287_v1  ;;  %240 = vset.pattern.permute.xlu0 %v288_v2 }
   0x2   :  { %8 = vsyncpa [#allocation3], 0  ;;  %51 = vperm.xlu1 %241, %v16_v0   ;;  %22 = vperm.xlu0 %240, %v16_v0   ;;  %v17_v3 = vld [vmem:[%s345_s1 + $0x8] sm:$0xff]  ;;  %v19_v4 = vld [vmem:[%s345_s1 + $0x18] sm:$0xff]  ;;  %v289_v5 = vmov 2   ;;  %v290_v7 = vmov 0.0|0.0  }
   0x3   :  { %v18_v6 = vld [vmem:[%s345_s1 + $0x10] sm:$0xff]  ;;  %225 = vmatprep.subr.bf16.mxu0 %v290_v7  ;;  %vm291_vm0 = vmmov 0   ;;  %v292_v8 = vmov 0.0   ;;  %v207_v11 = vld [vmem:[%s344_s0] ss:$0 sm:$0xff]  ;;  %vm103_vm1 = vcmask 261120  }
   0x4   :  { %222 = vmatprep.mubr.msk.f32.mxu0 %vm291_vm0, %v292_v8  ;;  %v102_v48 = vld [vmem:[%s346_s2] sm:$0xf]  ;;  %vm178_vm2 = vcmask 1043456   ;;  %s293_s22 = smov [#allocation2]   ;;  %vm191_vm3 = vcmask 0  }
   0x5   :  { %s199_s23 = sshll.u32 %s293_s22, 4  ;;  %s200_s23 = int_to_ptr.vmem [resolvable:$true] %s199_s23 }
   0x6   :  { %55 = vperm.xlu1 %241, %v17_v3   ;;  %27 = vperm.xlu0 %240, %v17_v3   ;;  %s263_s25 = scalar_lea.vmem %s200_s23, 16  ;;  %s267_s26 = scalar_lea.vmem %s200_s23, 32 }
   0x7   :  { %p264_p0 = scmp.ne.s32.totalorder %s200_s23, %s263_s25  ;;  %p268_p1 = scmp.lt.s32.totalorder %s200_s23, %s200_s23 }
   0x8   :  { %p269_p2 = scmp.lt.s32.totalorder %s267_s26, %s263_s25 }
   0xa   :  { %242 = vset.pattern.permute.xlu1 %v289_v5  ;;  %37 = vperm.xlu0 %240, %v19_v4   ;;  %p270_p3 = por %p269_p2, %p268_p1 }
   0xb   :  { %79 = vperm.xlu1 %242, %v17_v3  }
   0xc   :  { %p271_p4 = pnand %p270_p3, %p264_p0 }
   0xe   :  { %244 = vset.pattern.permute.xlu0 %v289_v5 }
   0xf   :  { %243 = vset.pattern.permute.xlu1 %v288_v2  ;;  %75 = vperm.xlu0 %244, %v16_v0  }
  0x10   :  { %32 = vperm.xlu1 %243, %v18_v6  }
  0x13   :  { %83 = vperm.xlu0 %244, %v18_v6  }
  0x14   :  { %245 = vset.pattern.permute.xlu1 %v287_v1 }
  0x15   :  { %59 = vperm.xlu1 %245, %v18_v6  }
  0x19   :  { %63 = vperm.xlu1 %245, %v19_v4  }
  0x1d   :  { %246 = vset.pattern.permute.xlu1 %v289_v5 }
  0x1e   :  { %87 = vperm.xlu1 %246, %v19_v4  }
  0x81   :  { %v52_v9 = vpop.permute.xlu1 %51  ;;  %v23_v10 = vpop.permute.xlu0 %22 }
  0x82   :  { %v46_v14 = vmul.f32 %v207_v11, %v23_v10 }
  0x84   :  { %v66_v17 = vadd.f32 %v52_v9, %v46_v14 }
  0x85   :  { %v56_v12 = vpop.permute.xlu1 %55  ;;  %v28_v13 = vpop.permute.xlu0 %27 }
  0x86   :  { %v47_v15 = vmul.f32 %v207_v11, %v28_v13  ;;  %247 = vtanh.f32 %v66_v17 }
  0x88   :  { %v67_v20 = vadd.f32 %v56_v12, %v47_v15 }
  0x89   :  { %v38_v16 = vpop.permute.xlu0 %37 }
  0x8a   :  { %v80_v18 = vpop.permute.xlu1 %79  ;;  %v49_v30 = vmul.f32 %v207_v11, %v38_v16 }
  0x8b   :  { %v91_v19 = vadd.f32 %v80_v18, %v47_v15 }
  0x8d   :  { %249 = vtanh.f32 %v91_v19 }
  0x8e   :  { %v76_v21 = vpop.permute.xlu0 %75  ;;  %251 = vtanh.f32 %v67_v20 }
  0x8f   :  { %v90_v22 = vadd.f32 %v76_v21, %v46_v14  ;;  %v33_v23 = vpop.permute.xlu1 %32 }
  0x90   :  { %v48_v25 = vmul.f32 %v207_v11, %v33_v23  ;;  %v248_v27 = vpop.eup %247 }
  0x91   :  { %253 = vtanh.f32 %v90_v22 }
  0x92   :  { %v84_v26 = vpop.permute.xlu0 %83 }
  0x93   :  { %v92_v31 = vadd.f32 %v84_v26, %v48_v25 }
  0x94   :  { %v60_v24 = vpop.permute.xlu1 %59 }
  0x95   :  { %v68_v33 = vadd.f32 %v60_v24, %v48_v25  ;;  %255 = vtanh.f32 %v92_v31 }
  0x97   :  { %v250_v29 = vpop.eup %249  ;;  %257 = vtanh.f32 %v68_v33 }
  0x98   :  { %v64_v28 = vpop.permute.xlu1 %63  ;;  %v252_v32 = vpop.eup %251 }
  0x99   :  { %v69_v35 = vadd.f32 %v64_v28, %v49_v30  ;;  %v99_v37 = vsub.f32 %v252_v32, %v250_v29 }
  0x9b   :  { %v254_v34 = vpop.eup %253  ;;  %259 = vtanh.f32 %v69_v35 }
  0x9c   :  { %v98_v36 = vsub.f32 %v248_v27, %v254_v34 }
  0x9d   :  { %v88_v38 = vpop.permute.xlu1 %87 }
  0x9e   :  { %v93_v39 = vadd.f32 %v88_v38, %v49_v30  ;;  %v226_v40 = vpack.c.bf16 %v99_v37, %v98_v36 }
  0x9f   :  { %v256_v41 = vpop.eup %255 }
  0xa0   :  { %261 = vtanh.f32 %v93_v39  ;;  %227 = vmatpush3.bf16.msra.mxu0 %v226_v40 }
  0xa1   :  { %228 = vmatprep.subr.bf16.mxu0 %v290_v7  ;;  %v258_v42 = vpop.eup %257 }
  0xa2   :  { %v100_v45 = vsub.f32 %v258_v42, %v256_v41 }
  0xa5   :  { %v260_v43 = vpop.eup %259 }
  0xaa   :  { %v262_v44 = vpop.eup %261 }
  0xab   :  { %v101_v46 = vsub.f32 %v260_v43, %v262_v44 }
  0xad   :  { %v229_v47 = vpack.c.bf16 %v101_v46, %v100_v45 }
  0xaf   :  { %230 = vmatpush3.bf16.msra.mxu0 %v229_v47 }
  0xb2   :  { %223 = vmatmul.mubr.msk.f32.vlgmr.msra.gmra.mrb[0].mxu0 %vm103_vm1, %v102_v48 }
 0x185   :  { %v173_v49 = vpop.f32.mrb[0].mxu0 }
 0x186   :  { %v177_v50 = vmul.f32 %v173_v49, %v173_v49  ;;  %v224_v51 = vpop.f32.mrb[1].mxu0 }
 0x188   :  { %v179_v52 = vsel %vm178_vm2, %v177_v50, 0.0 }
 0x189   :  { %180 = vadd.xlane.f32.xlu1 %v179_v52 }
 0x216   :  { %v181_v53 = vpop.xlane.xlu1 %180 }
 0x217   :  { %v182_v54 = vrot.slane %v181_v53, 4 }
 0x219   :  { %v183_v55 = vadd.f32 %v182_v54, %v181_v53 }
 0x21b   :  { %v184_v56 = vrot.slane %v183_v55, 2 }
 0x21d   :  { %v185_v57 = vadd.f32 %v184_v56, %v183_v55 }
 0x21f   :  { %v186_v58 = vrot.slane %v185_v57, 1 }
 0x221   :  { %v187_v59 = vadd.f32 %v186_v58, %v185_v57 }
 0x223   :  { %231 = vpush %v187_v59 }
 0x254   :  { %s232_s24 = spop %231 }
 0x255   :  { %s189_s2 = smul.f32 0.0078125, %s232_s24 }
 0x257   :  { %v190_v60 = vstv %s189_s2 }
 0x258   :  { %192 = vst.msk [vmem:[#allocation2] sm:$0x1] %vm191_vm3, %v190_v60 }
 0x259   :  { %274 = shalt.err (!%p271_p4)
}
 0x25a   :  { %s275_s29 = scalar_lea.hbm %s347_s3, 16 }
 0x25b   :  { %p276_p5 = scmp.ne.s32.totalorder %s347_s3, %s275_s29  ;;  %p279_p6 = scmp.lt.u32.totalorder %s275_s29, %s347_s3 }
 0x25d   :  { %p281_p7 = pnand %p279_p6, %p276_p5 }
 0x25f   :  { %284 = shalt.err (!%p281_p7)
}
 0x260   :  { %202 = dma.vmem_to_hbm [thread:$0]  %s200_s23, 16, %s347_s3, [#allocation3]  }
 0x261   :  { %285 = dma.done.wait [#allocation3], 16  }
 0x262   :  { %286 = vsyncadd [#allocation3], 4294967280 }
 0x263   :  { %206 = vsyncpa [#allocation3], 1 }

</bundles_post_ra>
